<compile_context>
chip_gen: v6e
topology: v6e:2x2x1
jax: 0.10.0
libtpu: 0.0.40
codegen_flags: <defaults>
</compile_context>

<pallas_src>
import functools

import jax
import jax.numpy as jnp
from jax.experimental import pallas as pl
from jax.experimental.pallas import tpu as pltpu


def _round_up(n, m):
    return ((n + m - 1) // m) * m


def _mlp_kernel(x_ref, w1_ref, b1_ref, w23_ref, b23_ref, o_ref):
    # fc1: (TB, D) bf16 @ (D, H) bf16 -> f32 MXU accumulation, + bias, ReLU.
    h1 = jnp.dot(x_ref[...], w1_ref[...], preferred_element_type=jnp.float32)
    h1 = jnp.maximum(h1 + b1_ref[...], 0.0)

    # dropout(p=0.1) is identity at inference (eval mode).

    # Folded fc2@fc3 as an MXU matvec: (TB, H) bf16 @ (H, 1) bf16 -> (TB, 1) f32.
    logits = jnp.dot(h1.astype(jnp.bfloat16), w23_ref[...],
                     preferred_element_type=jnp.float32) + b23_ref[0, 0]

    # sigmoid(z) = 1 / (1 + exp(-z)); exp + approx reciprocal both go to the EUP.
    o_ref[...] = pl.reciprocal(1.0 + jnp.exp(-logits), approx=True).astype(o_ref.dtype)


@functools.partial(jax.jit, static_argnames=("block_batch",))
def nn_forward(x, w1, b1, w2, b2, w3, b3, *, block_batch=8192):
    """Forward pass of NN(input_dim, 128) as one fused Pallas kernel.

    x:  (B, input_dim) f32
    w1: (input_dim, 128) f32, b1: (1, 128) f32
    w2: (128, 32) f32,        b2: (1, 32) f32
    w3: (32, 1) f32,          b3: (1, 1) f32
    returns (B, 1) f32 in [0, 1]
    """
    B, input_dim = x.shape
    hidden = w1.shape[1]

    # --- host-side algebraic fold of fc2/fc3 (exact: no activation between them) ---
    w23_col = (w2 @ w3).astype(jnp.bfloat16)          # (hidden, 1)
    b23 = (b2 @ w3 + b3).reshape(1, 1).astype(jnp.float32)

    # --- bf16 operands for the fc1 matmul (f32 accumulation inside the kernel) ---
    x_bf16 = x.astype(jnp.bfloat16)
    w1_bf16 = w1.astype(jnp.bfloat16)
    b1 = b1.astype(jnp.float32)

    # --- batch-tile selection with an explicit VMEM budget -----------------------
    # Per-row bytes: double-buffered bf16 x tile + f32 h1 intermediate
    #              + bf16 h1 copy + double-buffered f32 output.
    per_row = 2 * (2 * input_dim) + 4 * hidden + 2 * hidden + 2 * 4
    vmem_budget = 24 * 1024 * 1024          # headroom vs. v7x's 32 MiB scoped default
    tb_cap = max(16, (vmem_budget // per_row) // 16 * 16)

    TB = min(block_batch, tb_cap)
    # Keep the grid >= 2 steps whenever possible so the "parallel" axis actually
    # shards across both TensorCores on v7x.
    if B >= 32:
        TB = min(TB, _round_up(pl.cdiv(B, 2), 16))
    TB = min(TB, _round_up(B, 16))
    TB = max(16, _round_up(TB, 16))          # multiple of 16 (bf16 sublane packing)

    Bp = _round_up(B, TB)
    if Bp != B:
        x_bf16 = jnp.pad(x_bf16, ((0, Bp - B), (0, 0)))

    grid = (Bp // TB,)

    # Advisory cost estimate for XLA's scheduler around the custom call.
    flops = 2 * Bp * input_dim * hidden + 2 * Bp * hidden
    bytes_accessed = (Bp * input_dim * 2            # x (bf16)
                      + input_dim * hidden * 2      # w1 (bf16)
                      + hidden * 4 + hidden * 2 + 4 # b1, w23, b23
                      + Bp * 4)                     # output (f32)
    cost = pl.CostEstimate(flops=flops, transcendentals=2 * Bp,
                           bytes_accessed=bytes_accessed)

    out = pl.pallas_call(
        _mlp_kernel,
        out_shape=jax.ShapeDtypeStruct((Bp, 1), jnp.float32),
        grid=grid,
        in_specs=[
            pl.BlockSpec((TB, input_dim), lambda i: (i, 0)),      # x tile (pipelined)
            pl.BlockSpec((input_dim, hidden), lambda i: (0, 0)),  # w1: resident
            pl.BlockSpec((1, hidden), lambda i: (0, 0)),          # b1: resident
            pl.BlockSpec((hidden, 1), lambda i: (0, 0)),          # folded w23 column
            pl.BlockSpec(memory_space=pltpu.MemorySpace.SMEM),    # folded b23 scalar
        ],
        out_specs=pl.BlockSpec((TB, 1), lambda i: (i, 0)),
        compiler_params=pltpu.CompilerParams(
            dimension_semantics=("parallel",),
            vmem_limit_bytes=32 * 1024 * 1024,
        ),
        cost_estimate=cost,
    )(x_bf16, w1_bf16, b1, w23_col, b23)

    return out[:B]


def reference_forward_f32(x, w1, b1, w2, b2, w3, b3):
    h1 = jnp.maximum(x @ w1 + b1, 0.0)
    h2 = h1 @ w2 + b2
    h3 = h2 @ w3 + b3
    return jax.nn.sigmoid(h3)


def reference_forward_bf16(x, w1, b1, w2, b2, w3, b3):
    # Mirrors the kernel's bf16 fc1 / folded bf16 matvec math for a tight check.
    h1 = jnp.dot(x.astype(jnp.bfloat16), w1.astype(jnp.bfloat16),
                 preferred_element_type=jnp.float32)
    h1 = jnp.maximum(h1 + b1, 0.0)
    w23 = (w2 @ w3).astype(jnp.bfloat16)
    b23 = b2 @ w3 + b3
    logits = jnp.dot(h1.astype(jnp.bfloat16), w23,
                     preferred_element_type=jnp.float32) + b23
    return jax.nn.sigmoid(logits)


if __name__ == "__main__":
    # Small deterministic shapes consistent with the module:
    #   input_dim = 256 (embedding size), hidden_dim = 128, then 32, then 1.
    batch, input_dim, hidden_dim, mid_dim, out_dim = 8, 256, 128, 32, 1

    key = jax.random.PRNGKey(0)
    kx, k1, k2, k3, k4, k5, k6 = jax.random.split(key, 7)

    x = jax.random.normal(kx, (batch, input_dim), dtype=jnp.float32)

    w1 = jax.random.normal(k1, (input_dim, hidden_dim), dtype=jnp.float32) * 0.05
    b1 = jax.random.normal(k2, (1, hidden_dim), dtype=jnp.float32) * 0.05
    w2 = jax.random.normal(k3, (hidden_dim, mid_dim), dtype=jnp.float32) * 0.05
    b2 = jax.random.normal(k4, (1, mid_dim), dtype=jnp.float32) * 0.05
    w3 = jax.random.normal(k5, (mid_dim, out_dim), dtype=jnp.float32) * 0.05
    b3 = jax.random.normal(k6, (1, out_dim), dtype=jnp.float32) * 0.05

    out = nn_forward(x, w1, b1, w2, b2, w3, b3)
    out = jax.block_until_ready(out)
    assert out.shape == (batch, out_dim), out.shape

    # Tight check vs. a reference that mirrors the kernel's bf16 / folded math.
    ref_bf16 = reference_forward_bf16(x, w1, b1, w2, b2, w3, b3)
    assert jnp.allclose(out, ref_bf16, atol=2e-3, rtol=2e-3), "mismatch vs bf16 reference"

    # Looser sanity check against the full-f32 PyTorch-equivalent forward.
    ref_f32 = reference_forward_f32(x, w1, b1, w2, b2, w3, b3)
    assert jnp.allclose(out, ref_f32, atol=3e-2, rtol=3e-2), "mismatch vs f32 reference"

    print("KERNEL_OK")
</pallas_src>

<mosaic_0001>
module attributes {stable_mosaic.version = 11 : i64} {
  func.func @_mlp_kernel(%arg0: i32, %arg1: memref<16x256xbf16, #tpu.memory_space<vmem>>, %arg2: memref<256x128xbf16, #tpu.memory_space<vmem>>, %arg3: memref<1x128xf32, #tpu.memory_space<vmem>>, %arg4: memref<128x1xbf16, #tpu.memory_space<vmem>>, %arg5: memref<1x1xf32, #tpu.memory_space<smem>>, %arg6: memref<16x1xf32, #tpu.memory_space<vmem>>) attributes {dimension_semantics = [#tpu.dimension_semantics<parallel>], iteration_bounds = array<i64: 1>, scalar_prefetch = 0 : i64, scratch_operands = 0 : i64, tpu.core_type = #tpu.core_type<tc>, window_params = [{transform_indices = @transform_0, window_bounds = array<i64: 16, 256>}, {pipeline_mode = #tpu.pipeline_mode<synchronous>, transform_indices = @transform_1, window_bounds = array<i64: 256, 128>}, {pipeline_mode = #tpu.pipeline_mode<synchronous>, transform_indices = @transform_2, window_bounds = array<i64: 1, 128>}, {pipeline_mode = #tpu.pipeline_mode<synchronous>, transform_indices = @transform_3, window_bounds = array<i64: 128, 1>}, {transform_indices = @transform_4, window_bounds = array<i64: 1, 1>}, {transform_indices = @transform_5, window_bounds = array<i64: 16, 1>}]} {
    %c0 = arith.constant 0 : index
    %c0_0 = arith.constant 0 : index
    %0 = vector.load %arg1[%c0, %c0_0] : memref<16x256xbf16, #tpu.memory_space<vmem>>, vector<16x256xbf16>
    %c0_1 = arith.constant 0 : index
    %c0_2 = arith.constant 0 : index
    %1 = vector.load %arg2[%c0_1, %c0_2] : memref<256x128xbf16, #tpu.memory_space<vmem>>, vector<256x128xbf16>
    %cst = arith.constant dense<0.000000e+00> : vector<16x128xf32>
    %2 = tpu.matmul %0, %1, %cst {dimension_numbers = #tpu.dot_dimension_numbers<[1], [0], [0], [1], [0, 0, 1, 1], [], []>} : vector<16x256xbf16>, vector<256x128xbf16>, vector<16x128xf32> -> vector<16x128xf32>
    %c0_3 = arith.constant 0 : index
    %c0_4 = arith.constant 0 : index
    %3 = vector.load %arg3[%c0_3, %c0_4] : memref<1x128xf32, #tpu.memory_space<vmem>>, vector<1x128xf32>
    %4 = vector.broadcast %3 : vector<1x128xf32> to vector<16x128xf32>
    %5 = arith.addf %2, %4 : vector<16x128xf32>
    %cst_5 = arith.constant 0.000000e+00 : f32
    %6 = vector.broadcast %cst_5 : f32 to vector<16x128xf32>
    %7 = arith.maximumf %5, %6 : vector<16x128xf32>
    %8 = arith.truncf %7 : vector<16x128xf32> to vector<16x128xbf16>
    %c0_6 = arith.constant 0 : index
    %c0_7 = arith.constant 0 : index
    %9 = vector.load %arg4[%c0_6, %c0_7] : memref<128x1xbf16, #tpu.memory_space<vmem>>, vector<128x1xbf16>
    %cst_8 = arith.constant dense<0.000000e+00> : vector<16x1xf32>
    %10 = tpu.matmul %8, %9, %cst_8 {dimension_numbers = #tpu.dot_dimension_numbers<[1], [0], [0], [1], [0, 0, 1, 1], [], []>} : vector<16x128xbf16>, vector<128x1xbf16>, vector<16x1xf32> -> vector<16x1xf32>
    %c0_9 = arith.constant 0 : index
    %c0_10 = arith.constant 0 : index
    %11 = memref.load %arg5[%c0_9, %c0_10] : memref<1x1xf32, #tpu.memory_space<smem>>
    %12 = vector.broadcast %11 : f32 to vector<16x1xf32>
    %13 = arith.addf %10, %12 : vector<16x1xf32>
    %cst_11 = arith.constant 0.000000e+00 : f32
    %14 = vector.broadcast %cst_11 : f32 to vector<16x1xf32>
    %15 = arith.subf %14, %13 : vector<16x1xf32>
    %16 = math.exp %15 : vector<16x1xf32>
    %cst_12 = arith.constant 1.000000e+00 : f32
    %17 = vector.broadcast %cst_12 : f32 to vector<16x1xf32>
    %18 = arith.addf %17, %16 : vector<16x1xf32>
    %19 = tpu.reciprocal %18 {approx = true} : vector<16x1xf32> -> vector<16x1xf32>
    %c0_13 = arith.constant 0 : index
    %c0_14 = arith.constant 0 : index
    %20 = vector.load %arg6[%c0_13, %c0_14] : memref<16x1xf32, #tpu.memory_space<vmem>>, vector<16x1xf32>
    tpu.vector_store %arg6[%c0_13, %c0_14], %19 {strides = array<i32>} : memref<16x1xf32, #tpu.memory_space<vmem>>, vector<16x1xf32>,
    return
  }
  func.func @transform_0(%arg0: i32) -> (i32, i32) {
    %c0_i32 = arith.constant 0 : i32
    %c0_i32_0 = arith.constant 0 : i32
    return %arg0, %c0_i32 : i32, i32
  }
  func.func @transform_1(%arg0: i32) -> (i32, i32) {
    %c0_i32 = arith.constant 0 : i32
    %c0_i32_0 = arith.constant 0 : i32
    %c0_i32_1 = arith.constant 0 : i32
    return %c0_i32, %c0_i32_0 : i32, i32
  }
  func.func @transform_2(%arg0: i32) -> (i32, i32) {
    %c0_i32 = arith.constant 0 : i32
    %c0_i32_0 = arith.constant 0 : i32
    %c0_i32_1 = arith.constant 0 : i32
    return %c0_i32, %c0_i32_0 : i32, i32
  }
  func.func @transform_3(%arg0: i32) -> (i32, i32) {
    %c0_i32 = arith.constant 0 : i32
    %c0_i32_0 = arith.constant 0 : i32
    %c0_i32_1 = arith.constant 0 : i32
    return %c0_i32, %c0_i32_0 : i32, i32
  }
  func.func @transform_4(%arg0: i32) -> (i32, i32) {
    %c0_i32 = arith.constant 0 : i32
    %c0_i32_0 = arith.constant 0 : i32
    %c0_i32_1 = arith.constant 0 : i32
    return %c0_i32, %c0_i32_0 : i32, i32
  }
  func.func @transform_5(%arg0: i32) -> (i32, i32) {
    %c0_i32 = arith.constant 0 : i32
    %c0_i32_0 = arith.constant 0 : i32
    return %arg0, %c0_i32 : i32, i32
  }
}

</mosaic_0001>

<bundles_post_ra>
// kernel: nn_forward.1
= control target key start
LH: loop header
LB: loop body
LE: loop exit
PB: predicated region body
PF: predicated region fallthrough
CT: control target
= control target key end

     0   :  { %v452_v1 = vmov 0.0   ;;  %vm453_vm0 = vmmov 0   ;;  %vm330_vm1 = vcmask 7168   ;;  %s583_s1 = inlined_call_operand.vmem [shape: bf16[256,128], index: 1, kind: input, shape index: {}]   ;;  %s584_s0 = inlined_call_operand.vmem [shape: bf16[16,256], index: 0, kind: input, shape index: {}]   ;;  %s585_s3 = inlined_call_operand.vmem [shape: bf16[128,1], index: 3, kind: input, shape index: {}]   ;;  %s586_s2 = inlined_call_operand.vmem [shape: f32[1,128], index: 2, kind: input, shape index: {}]   ;;  %s587_s4 = inlined_call_operand.<no memory space> [shape: f32[1,1], index: 4, kind: input, shape index: {}]   ;;  %s588_s5 = inlined_call_operand.vmem [shape: f32[16,1], index: 5, kind: output, shape index: {}]  }
   0x1   :  { %v417_v0 = vld [vmem:[%s583_s1 + $0x78] sm:$0xff]   ;;  %395 = vmatprep.subr.bf16.mxu1 %v452_v1  ;;  %v419_v3 = vld [vmem:[%s583_s1 + $0x70] sm:$0xff]   ;;  %v421_v5 = vld [vmem:[%s583_s1 + $0x68] sm:$0xff]   ;;  %411 = vmatprep.mubr.msk.bf16.mxu1 %vm453_vm0, %v452_v1  ;;  %v230_v39 = vstv %s587_s4 }
   0x2   :  { %v418_v2 = vld [vmem:[%s583_s1 + $0x38] sm:$0xff]   ;;  %364 = vmatprep.subr.bf16.mxu0 %v417_v0  ;;  %v420_v4 = vld [vmem:[%s583_s1 + $0x30] sm:$0xff]   ;;  %v422_v6 = vld [vmem:[%s583_s1 + $0x28] sm:$0xff]  }
   0x3   :  { %365 = vmatpush3.bf16.msra.mxu0 %v418_v2  ;;  %v423_v7 = vld [vmem:[%s583_s1 + $0x60] sm:$0xff]   ;;  %v425_v9 = vld [vmem:[%s583_s1 + $0x58] sm:$0xff]   ;;  %v427_v11 = vld [vmem:[%s583_s1 + $0x50] sm:$0xff]  }
   0x4   :  { %366 = vmatprep.subr.bf16.mxu0 %v419_v3  ;;  %v424_v8 = vld [vmem:[%s583_s1 + $0x20] sm:$0xff]   ;;  %v426_v10 = vld [vmem:[%s583_s1 + $0x18] sm:$0xff]   ;;  %v428_v12 = vld [vmem:[%s583_s1 + $0x10] sm:$0xff]  }
   0x5   :  { %v435_v13 = vld [vmem:[%s584_s0 + $0x4] ss:$8 sps:$4 sm:$0xff]   ;;  %v436_v14 = vld [vmem:[%s585_s3 + $0x38] sm:$0xff]   ;;  %v437_v16 = vld [vmem:[%s585_s3 + $0x30] sm:$0xff]  }
   0x6   :  { %v429_v15 = vld [vmem:[%s583_s1 + $0x48] sm:$0xff]   ;;  %201 = vmatprep.mubr.bf16.mxu0 %v435_v13  ;;  %396 = vmatpush3.bf16.msra.mxu1 %v436_v14  ;;  %v431_v18 = vld [vmem:[%s583_s1 + $0x40] sm:$0xff]   ;;  %v440_v23 = vld [vmem:[%s585_s3 + $0x18] sm:$0xff]  }
   0x7   :  { %367 = vmatpush3.bf16.msra.mxu0 %v420_v4  ;;  %v430_v17 = vld [vmem:[%s583_s1 + $0x8] sm:$0xff]   ;;  %397 = vmatprep.subr.bf16.mxu1 %v452_v1  ;;  %v432_v20 = vld [vmem:[%s583_s1] sm:$0xff]   ;;  %v441_v24 = vld [vmem:[%s585_s3 + $0x10] sm:$0xff]  }
   0x8   :  { %368 = vmatprep.subr.bf16.mxu0 %v421_v5  ;;  %v438_v19 = vld [vmem:[%s585_s3 + $0x28] sm:$0xff]   ;;  %v439_v21 = vld [vmem:[%s585_s3 + $0x20] sm:$0xff]  }
   0x9   :  { %v433_v22 = vld [vmem:[%s584_s0] ss:$8 sps:$4 sm:$0xff]  }
   0xa   :  { %398 = vmatpush3.bf16.msra.mxu1 %v437_v16  ;;  %v442_v25 = vld [vmem:[%s585_s3 + $0x8] sm:$0xff]   ;;  %v443_v26 = vld [vmem:[%s585_s3] sm:$0xff]  }
   0xb   :  { %369 = vmatpush3.bf16.msra.mxu0 %v422_v6  ;;  %399 = vmatprep.subr.bf16.mxu1 %v452_v1  ;;  %v337_v30 = vld [vmem:[%s586_s2] ss:$0 sm:$0xff] }
   0xc   :  { %370 = vmatprep.subr.bf16.mxu0 %v423_v7 }
   0xe   :  { %400 = vmatpush3.bf16.msra.mxu1 %v438_v19 }
   0xf   :  { %371 = vmatpush3.bf16.msra.mxu0 %v424_v8  ;;  %401 = vmatprep.subr.bf16.mxu1 %v452_v1 }
  0x10   :  { %372 = vmatprep.subr.bf16.mxu0 %v425_v9 }
  0x12   :  { %402 = vmatpush3.bf16.msra.mxu1 %v439_v21 }
  0x13   :  { %373 = vmatpush3.bf16.msra.mxu0 %v426_v10  ;;  %403 = vmatprep.subr.bf16.mxu1 %v452_v1 }
  0x14   :  { %374 = vmatprep.subr.bf16.mxu0 %v427_v11 }
  0x16   :  { %404 = vmatpush3.bf16.msra.mxu1 %v440_v23 }
  0x17   :  { %375 = vmatpush3.bf16.msra.mxu0 %v428_v12  ;;  %405 = vmatprep.subr.bf16.mxu1 %v452_v1 }
  0x18   :  { %376 = vmatprep.subr.bf16.mxu0 %v429_v15 }
  0x1a   :  { %406 = vmatpush3.bf16.msra.mxu1 %v441_v24 }
  0x1b   :  { %377 = vmatpush3.bf16.msra.mxu0 %v430_v17  ;;  %407 = vmatprep.subr.bf16.mxu1 %v452_v1 }
  0x1c   :  { %378 = vmatprep.subr.bf16.mxu0 %v431_v18 }
  0x1e   :  { %408 = vmatpush3.bf16.msra.mxu1 %v442_v25 }
  0x1f   :  { %379 = vmatpush3.bf16.msra.mxu0 %v432_v20  ;;  %409 = vmatprep.subr.bf16.mxu1 %v452_v1 }
  0x22   :  { %202 = vmatmul.mubr.bf16.vlgmr.msra.gmra.mxu0 %v433_v22  ;;  %410 = vmatpush3.bf16.msra.mxu1 %v443_v26 }
  0xe2   :  { %v380_v27 = vpop.f32.mrf.mxu0 }
  0xe4   :  { %v381_v28 = vpop.f32.mrf.mxu0 }
  0xe5   :  { %v382_v29 = vadd.f32 %v381_v28, %v380_v27 }
  0xe6   :  { %v383_v31 = vpop.f32.mrf.mxu0 }
  0xe7   :  { %v204_v33 = vadd.f32 %v382_v29, %v337_v30 }
  0xe8   :  { %v384_v32 = vpop.f32.mrf.mxu0 }
  0xe9   :  { %v385_v34 = vadd.f32 %v384_v32, %v383_v31  ;;  %v210_v36 = vmax.f32 %v204_v33, 0.0 }
  0xeb   :  { %v207_v35 = vadd.f32 %v385_v34, %v337_v30 }
  0xed   :  { %v211_v37 = vmax.f32 %v207_v35, 0.0 }
  0xef   :  { %v212_v38 = vpack.c.bf16 %v211_v37, %v210_v36 }
  0xf1   :  { %412 = vmatmul.mubr.bf16.vlgmr.msra.gmra.mxu1 %v212_v38 }
 0x1b1   :  { %v313_v40 = vpop.f32.mrf.mxu1 }
 0x1b2   :  { %v314_v41 = vadd.f32 %v313_v40, %v230_v39 }
 0x1b3   :  { %v413_v42 = vpop.f32.mrf.mxu1 }
 0x1b4   :  { %v320_v43 = vsub.f32 0.0, %v314_v41 }
 0x1b5   :  { %v316_v44 = vpop.f32.mrf.mxu1 }
 0x1b6   :  { %v322_v45 = vmul.f32 1.442695, %v320_v43  ;;  %v317_v46 = vadd.f32 %v316_v44, %v230_v39 }
 0x1b7   :  { %v414_v47 = vpop.f32.mrf.mxu1 }
 0x1b8   :  { %444 = vpow2.f32 %v322_v45  ;;  %v321_v48 = vsub.f32 0.0, %v317_v46 }
 0x1ba   :  { %v324_v49 = vmul.f32 1.442695, %v321_v48 }
 0x1bc   :  { %446 = vpow2.f32 %v324_v49 }
 0x1c5   :  { %v445_v50 = vpop.eup %444 }
 0x1c6   :  { %v326_v51 = vadd.f32 1.0, %v445_v50 }
 0x1c8   :  { %448 = vrcp.f32 %v326_v51 }
 0x1c9   :  { %v447_v52 = vpop.eup %446 }
 0x1ca   :  { %v327_v53 = vadd.f32 1.0, %v447_v52 }
 0x1cc   :  { %450 = vrcp.f32 %v327_v53 }
 0x1d5   :  { %v449_v54 = vpop.eup %448 }
 0x1d6   :  { %331 = vst.msk [vmem:[%s588_s5] sm:$0xff] %vm330_vm1, %v449_v54 }
 0x1d9   :  { %v451_v55 = vpop.eup %450 }
 0x1da   :  { %332 = vst.msk [vmem:[%s588_s5 + $0x8] sm:$0xff] %vm330_vm1, %v451_v55 }

</bundles_post_ra>
